<compile_context>
chip_gen: v5e
topology: v5e:2x2
jax: 0.10.0
libtpu: 0.0.40
codegen_flags: <defaults>
</compile_context>

<pallas_src>
import functools
import math

import jax
import jax.numpy as jnp
from jax.experimental import pallas as pl
from jax.experimental.pallas import tpu as pltpu


def _actor_kernel(x_ref, wf_ref, cf_ref, o_ref, *, length):
    # x_ref:  (TB, 3L, E)  input batch tile (streamed per grid step)
    # wf_ref: (3, E, 3)    folded weights; wf_ref[s] maps stream s -> 3 logits
    # cf_ref: (1, 3)       folded constant (attention bias + proj bias terms)
    # o_ref:  (TB*L, 3)    sigmoid scores, row = flat (batch, position), col = modality
    L = length
    TB = x_ref.shape[0]
    E = x_ref.shape[2]

    # Per-modality streams, flattened so each feeds the MXU with one big dot.
    xt = x_ref[:, 0 * L:1 * L, :].reshape(TB * L, E)
    xa = x_ref[:, 1 * L:2 * L, :].reshape(TB * L, E)
    xv = x_ref[:, 2 * L:3 * L, :].reshape(TB * L, E)

    logits = (
        jnp.dot(xt, wf_ref[0], preferred_element_type=jnp.float32)
        + jnp.dot(xa, wf_ref[1], preferred_element_type=jnp.float32)
        + jnp.dot(xv, wf_ref[2], preferred_element_type=jnp.float32)
        + cf_ref[...]                      # (1, 3) broadcast, hoisted (once/step)
    )                                      # (TB*L, 3) float32
    o_ref[...] = jax.nn.sigmoid(logits).astype(o_ref.dtype)


def _fold_weights(proj_w, proj_b, att_w, att_b):
    """Fold proj_{t,a,v} into the attention_{t,a,v} weight columns.

    proj_w: (3, E, E) stored (in, out): y = x @ W + b.   att_w: (3, 3E, 1).
    Returns wf (3, E, 3) with wf[s, :, m] = coefficient on stream s in
    modality m's logit, and cf (1, 3) constant terms.
    """
    E = proj_w.shape[-1]
    a0 = att_w[:, 0 * E:1 * E, 0]                       # (3, E) coeff on x_m
    a1 = att_w[:, 1 * E:2 * E, 0]                       # (3, E) coeff on proj_m(x_m - x_o1)
    a2 = att_w[:, 2 * E:3 * E, 0]                       # (3, E) coeff on proj_m(x_m - x_o2)
    v1 = jnp.einsum('mij,mj->mi', proj_w, a1)           # (3, E) = W_m @ a1_m
    v2 = jnp.einsum('mij,mj->mi', proj_w, a2)           # (3, E) = W_m @ a2_m
    u = a0 + v1 + v2                                    # coefficient on x_m itself
    const = (att_b[:, 0, 0]
             + jnp.einsum('mj,mj->m', proj_b, a1)
             + jnp.einsum('mj,mj->m', proj_b, a2))      # (3,)
    # Modality order of the "other" streams follows the PyTorch forward:
    #   t: (x_t, x_a, x_v), a: (x_a, x_t, x_v), v: (x_v, x_t, x_a)
    wf = jnp.stack([
        jnp.stack([u[0], -v1[1], -v1[2]], axis=-1),     # contributions of x_t
        jnp.stack([-v1[0], u[1], -v2[2]], axis=-1),     # contributions of x_a
        jnp.stack([-v2[0], -v2[1], u[2]], axis=-1),     # contributions of x_v
    ], axis=0).astype(jnp.float32)                      # (3, E, 3)
    cf = const.reshape(1, 3).astype(jnp.float32)
    return wf, cf


def _vmem_limit_bytes():
    """Generation-aware scoped-VMEM request (v7x: 64 MiB phys, v5e/v6e: 128 MiB)."""
    try:
        cap = int(pltpu.get_tpu_info().vmem_capacity_bytes)
    except Exception:
        cap = 64 << 20                                  # v7x-conservative fallback
    return int(min(cap // 2, 64 << 20))


def _pick_batch_tile(batch, length, emb, itemsize, vmem_limit, weight_bytes):
    # Per batch row, per pipeline buffer: (3L, E) input + (L, 3) output.
    row_bytes = (3 * length * emb + 3 * length) * itemsize
    budget = max(vmem_limit - weight_bytes, 2 * row_bytes)
    tb = max(1, budget // (2 * row_bytes))              # double-buffered in+out
    # Keep each input tile to a few MiB so the DMA pipeline stays granular.
    tb = min(tb, max(1, (4 << 20) // max(3 * length * emb * itemsize, 1)))
    # >= 2 grid steps when possible: v7x megacore sharding + DMA/compute overlap.
    if batch > 1:
        tb = min(tb, pl.cdiv(batch, 2))
    tb = min(tb, batch)
    # The (TB*L, 3) output block needs its sublane dim to be a multiple of 8
    # unless the block covers the whole array.
    unit = 8 // math.gcd(length, 8)
    if tb % unit != 0:
        tb = (tb // unit) * unit or batch
    return int(tb)


def actor_forward(inputs, proj_w, proj_b, att_w, att_b, *, length, batch_tile=None):
    """Pallas equivalent of Actor.forward.

    inputs: (B, 3L, E) float32
    proj_w: (3, E, E)  proj_{t,a,v} weights stored (in, out)
    proj_b: (3, E)
    att_w:  (3, 3E, 1) attention_{t,a,v} Linear(3E, 1) weight columns
    att_b:  (3, 1, 1)
    returns (B, 3L, 1) — matches torch.cat((action_t, action_a, action_v), 1)
    """
    B, S3, E = inputs.shape
    L = length
    assert S3 == 3 * L, (S3, L)
    itemsize = jnp.dtype(inputs.dtype).itemsize

    wf, cf = _fold_weights(proj_w, proj_b, att_w, att_b)
    vmem_limit = _vmem_limit_bytes()
    weight_bytes = (wf.size + cf.size) * 4
    TB = batch_tile if batch_tile is not None else _pick_batch_tile(
        B, L, E, itemsize, vmem_limit, weight_bytes)
    grid = (pl.cdiv(B, TB),)

    kernel = functools.partial(_actor_kernel, length=L)

    scores = pl.pallas_call(
        kernel,
        out_shape=jax.ShapeDtypeStruct((B * L, 3), inputs.dtype),
        grid_spec=pltpu.PrefetchScalarGridSpec(
            num_scalar_prefetch=0,
            grid=grid,
            in_specs=[
                pl.BlockSpec((TB, 3 * L, E), lambda i: (i, 0, 0)),  # streamed tile
                pl.BlockSpec((3, E, 3), lambda i: (0, 0, 0)),       # resident weights
                pl.BlockSpec((1, 3), lambda i: (0, 0)),             # resident consts
            ],
            out_specs=pl.BlockSpec((TB * L, 3), lambda i: (i, 0)),  # one dense store/step
        ),
        compiler_params=pltpu.CompilerParams(
            dimension_semantics=("parallel",),
            vmem_limit_bytes=vmem_limit,
        ),
    )(inputs, wf, cf)

    # Layout plumbing only (output is E x smaller than the input):
    # scores[b*L + l, m] -> action[b, m*L + l, 0].
    action = jnp.transpose(scores.reshape(B, L, 3), (0, 2, 1)).reshape(B, 3 * L, 1)
    return action


def actor_forward_ref(inputs, proj_w, proj_b, att_w, att_b, *, length):
    """Plain-JAX reference mirroring the PyTorch forward (cat then Linear, no fold)."""
    L = length
    x_t, x_a, x_v = inputs[:, :L], inputs[:, L:2 * L], inputs[:, 2 * L:]

    def branch(m, xm, xo1, xo2):
        p1 = (xm - xo1) @ proj_w[m] + proj_b[m]
        p2 = (xm - xo2) @ proj_w[m] + proj_b[m]
        feats = jnp.concatenate([xm, p1, p2], axis=-1)            # (B, L, 3E)
        return jax.nn.sigmoid(feats @ att_w[m] + att_b[m])        # (B, L, 1)

    a_t = branch(0, x_t, x_a, x_v)
    a_a = branch(1, x_a, x_t, x_v)
    a_v = branch(2, x_v, x_t, x_a)
    return jnp.concatenate([a_t, a_a, a_v], axis=1)               # (B, 3L, 1)


# TODO(synk): Actor.fused()/Actor.temporal() (Cross_Attention mul, TransformerEncoder,
# BatchNorm1d, Dropout, classifier) are separate methods, not part of forward(), and
# are not implemented here.

if __name__ == "__main__":
    B, L, E = 2, 8, 32          # batch, seqlength, emb_size
    key = jax.random.PRNGKey(0)
    ks = jax.random.split(key, 5)

    inputs = jax.random.normal(ks[0], (B, 3 * L, E), dtype=jnp.float32)
    proj_w = jax.random.normal(ks[1], (3, E, E), dtype=jnp.float32) / math.sqrt(E)
    proj_b = 0.1 * jax.random.normal(ks[2], (3, E), dtype=jnp.float32)
    att_w = jax.random.normal(ks[3], (3, 3 * E, 1), dtype=jnp.float32) / math.sqrt(3 * E)
    att_b = 0.1 * jax.random.normal(ks[4], (3, 1, 1), dtype=jnp.float32)

    fwd = jax.jit(functools.partial(actor_forward, length=L))
    out = jax.block_until_ready(fwd(inputs, proj_w, proj_b, att_w, att_b))

    ref = actor_forward_ref(inputs, proj_w, proj_b, att_w, att_b, length=L)
    assert out.shape == (B, 3 * L, 1), out.shape
    max_err = float(jnp.max(jnp.abs(out - ref)))
    # The proj->attention fold reassociates FP ops; allow ~1e-6-level drift.
    assert max_err < 1e-4, max_err

    print("KERNEL_OK")
</pallas_src>

<mosaic_0001>
module attributes {stable_mosaic.version = 11 : i64} {
  func.func @_actor_kernel(%arg0: i32, %arg1: memref<1x24x32xf32, #tpu.memory_space<vmem>>, %arg2: memref<3x32x3xf32, #tpu.memory_space<vmem>>, %arg3: memref<1x3xf32, #tpu.memory_space<vmem>>, %arg4: memref<8x3xf32, #tpu.memory_space<vmem>>) attributes {dimension_semantics = [#tpu.dimension_semantics<parallel>], iteration_bounds = array<i64: 2>, scalar_prefetch = 0 : i64, scratch_operands = 0 : i64, tpu.core_type = #tpu.core_type<tc>, window_params = [{transform_indices = @transform_0, window_bounds = array<i64: 1, 24, 32>}, {pipeline_mode = #tpu.pipeline_mode<synchronous>, transform_indices = @transform_1, window_bounds = array<i64: 3, 32, 3>}, {pipeline_mode = #tpu.pipeline_mode<synchronous>, transform_indices = @transform_2, window_bounds = array<i64: 1, 3>}, {transform_indices = @transform_3, window_bounds = array<i64: 8, 3>}]} {
    %c0 = arith.constant 0 : index
    %c0_0 = arith.constant 0 : index
    %c0_1 = arith.constant 0 : index
    %0 = vector.load %arg1[%c0, %c0_0, %c0_1] : memref<1x24x32xf32, #tpu.memory_space<vmem>>, vector<1x8x32xf32>
    %1 = vector.shape_cast %0 : vector<1x8x32xf32> to vector<8x32xf32>
    %c0_2 = arith.constant 0 : index
    %c8 = arith.constant 8 : index
    %c0_3 = arith.constant 0 : index
    %2 = vector.load %arg1[%c0_2, %c8, %c0_3] : memref<1x24x32xf32, #tpu.memory_space<vmem>>, vector<1x8x32xf32>
    %3 = vector.shape_cast %2 : vector<1x8x32xf32> to vector<8x32xf32>
    %c0_4 = arith.constant 0 : index
    %c16 = arith.constant 16 : index
    %c0_5 = arith.constant 0 : index
    %4 = vector.load %arg1[%c0_4, %c16, %c0_5] : memref<1x24x32xf32, #tpu.memory_space<vmem>>, vector<1x8x32xf32>
    %5 = vector.shape_cast %4 : vector<1x8x32xf32> to vector<8x32xf32>
    %c0_6 = arith.constant 0 : index
    %c0_7 = arith.constant 0 : index
    %c0_8 = arith.constant 0 : index
    %6 = vector.load %arg2[%c0_6, %c0_7, %c0_8] : memref<3x32x3xf32, #tpu.memory_space<vmem>>, vector<1x32x3xf32>
    %7 = vector.shape_cast %6 : vector<1x32x3xf32> to vector<32x3xf32>
    %cst = arith.constant dense<0.000000e+00> : vector<8x3xf32>
    %8 = tpu.matmul %1, %7, %cst {dimension_numbers = #tpu.dot_dimension_numbers<[1], [0], [0], [1], [0, 0, 1, 1], [], []>} : vector<8x32xf32>, vector<32x3xf32>, vector<8x3xf32> -> vector<8x3xf32>
    %c1 = arith.constant 1 : index
    %c0_9 = arith.constant 0 : index
    %c0_10 = arith.constant 0 : index
    %9 = vector.load %arg2[%c1, %c0_9, %c0_10] : memref<3x32x3xf32, #tpu.memory_space<vmem>>, vector<1x32x3xf32>
    %10 = vector.shape_cast %9 : vector<1x32x3xf32> to vector<32x3xf32>
    %cst_11 = arith.constant dense<0.000000e+00> : vector<8x3xf32>
    %11 = tpu.matmul %3, %10, %cst_11 {dimension_numbers = #tpu.dot_dimension_numbers<[1], [0], [0], [1], [0, 0, 1, 1], [], []>} : vector<8x32xf32>, vector<32x3xf32>, vector<8x3xf32> -> vector<8x3xf32>
    %12 = arith.addf %8, %11 : vector<8x3xf32>
    %c2 = arith.constant 2 : index
    %c0_12 = arith.constant 0 : index
    %c0_13 = arith.constant 0 : index
    %13 = vector.load %arg2[%c2, %c0_12, %c0_13] : memref<3x32x3xf32, #tpu.memory_space<vmem>>, vector<1x32x3xf32>
    %14 = vector.shape_cast %13 : vector<1x32x3xf32> to vector<32x3xf32>
    %cst_14 = arith.constant dense<0.000000e+00> : vector<8x3xf32>
    %15 = tpu.matmul %5, %14, %cst_14 {dimension_numbers = #tpu.dot_dimension_numbers<[1], [0], [0], [1], [0, 0, 1, 1], [], []>} : vector<8x32xf32>, vector<32x3xf32>, vector<8x3xf32> -> vector<8x3xf32>
    %16 = arith.addf %12, %15 : vector<8x3xf32>
    %c0_15 = arith.constant 0 : index
    %c0_16 = arith.constant 0 : index
    %17 = vector.load %arg3[%c0_15, %c0_16] : memref<1x3xf32, #tpu.memory_space<vmem>>, vector<1x3xf32>
    %18 = vector.broadcast %17 : vector<1x3xf32> to vector<8x3xf32>
    %19 = arith.addf %16, %18 : vector<8x3xf32>
    %20 = arith.negf %19 : vector<8x3xf32>
    %21 = math.exp %20 : vector<8x3xf32>
    %cst_17 = arith.constant 1.000000e+00 : f32
    %22 = vector.broadcast %cst_17 : f32 to vector<8x3xf32>
    %23 = arith.addf %22, %21 : vector<8x3xf32>
    %24 = arith.divf %22, %23 : vector<8x3xf32>
    %c0_18 = arith.constant 0 : index
    %c0_19 = arith.constant 0 : index
    %25 = vector.load %arg4[%c0_18, %c0_19] : memref<8x3xf32, #tpu.memory_space<vmem>>, vector<8x3xf32>
    tpu.vector_store %arg4[%c0_18, %c0_19], %24 {strides = array<i32>} : memref<8x3xf32, #tpu.memory_space<vmem>>, vector<8x3xf32>,
    return
  }
  func.func @transform_0(%arg0: i32) -> (i32, i32, i32) {
    %c0_i32 = arith.constant 0 : i32
    %c0_i32_0 = arith.constant 0 : i32
    %c0_i32_1 = arith.constant 0 : i32
    return %arg0, %c0_i32, %c0_i32_0 : i32, i32, i32
  }
  func.func @transform_1(%arg0: i32) -> (i32, i32, i32) {
    %c0_i32 = arith.constant 0 : i32
    %c0_i32_0 = arith.constant 0 : i32
    %c0_i32_1 = arith.constant 0 : i32
    %c0_i32_2 = arith.constant 0 : i32
    return %c0_i32, %c0_i32_0, %c0_i32_1 : i32, i32, i32
  }
  func.func @transform_2(%arg0: i32) -> (i32, i32) {
    %c0_i32 = arith.constant 0 : i32
    %c0_i32_0 = arith.constant 0 : i32
    %c0_i32_1 = arith.constant 0 : i32
    return %c0_i32, %c0_i32_0 : i32, i32
  }
  func.func @transform_3(%arg0: i32) -> (i32, i32) {
    %c0_i32 = arith.constant 0 : i32
    %c0_i32_0 = arith.constant 0 : i32
    return %arg0, %c0_i32 : i32, i32
  }
}

</mosaic_0001>

<bundles_post_ra>
// kernel: actor_forward.1
= control target key start
LH: loop header
LB: loop body
LE: loop exit
PB: predicated region body
PF: predicated region fallthrough
CT: control target
= control target key end

     0   :  { %s399_s12 = smov 0   ;;  %s459_s0 = inlined_call_operand.vmem [shape: f32[2,24,32], index: 0, kind: input, shape index: {}]   ;;  %s460_s1 = inlined_call_operand.vmem [shape: f32[3,32,3], index: 1, kind: input, shape index: {}]   ;;  %s461_s2 = inlined_call_operand.vmem [shape: f32[1,3], index: 2, kind: input, shape index: {}]   ;;  %s462_s3 = inlined_call_operand.vmem [shape: f32[16,3], index: 3, kind: output, shape index: {}]  }
   0x1 LB: > { %s336_s13 = sadd.s32 4294967295, %s377_s12   ;;  %p340_p0 = scmp.ge.s32.totalorder %s377_s12, 1  ;;  %s377_s12 = sphi %s399_s12, %s13_s12  }
   0x2   : > { %p137_p1 = scmp.lt.s32.totalorder %s377_s12, 3 }
   0x4   : > { %p138_p2 = pnand %p340_p0, %p137_p1 }
   0x5   : > { %p160_p3 = scmp.lt.s32.totalorder (!%p138_p2), %s336_s13, 1 }
   0x6   : > { %141 = sbr.rel (%p138_p2) target bundleno = 184 (0xb8), region = 32 }
   0xb   : > { %v352_v0 = vld [vmem:[%s460_s1 + $0x58] sm:$0xff]  ;;  %v351_v1 = vld [vmem:[%s460_s1 + $0x50] sm:$0xff]  ;;  %v350_v5 = vld [vmem:[%s460_s1 + $0x48] sm:$0xff]  ;;  %s464_s13 = smov (!%p160_p3, %s336_s13), 1  ;;  %vm181_vm0 = vcmask 261120   ;;  %vm281_vm4 = vcmask 23552  }
   0xc   : > { %v346_v2 = vld [vmem:[%s460_s1 + $0x38] sm:$0xff]  ;;  %248 = vmatpush.msra.mxu2 %v352_v0  ;;  %v345_v4 = vld [vmem:[%s460_s1 + $0x30] sm:$0xff]  ;;  %v344_v7 = vld [vmem:[%s460_s1 + $0x28] sm:$0xff]  ;;  %s357_s7 = smul.u32 24, %s464_s13  ;;  %s342_s19 = sshll.u32 %s464_s13, 3 }
   0xd   : > { %197 = vmatpush.msra.mxu0 %v346_v2  ;;  %v175_v3 = vld [vmem:[%s460_s1 + $0x18] sm:$0xff]  ;;  %v174_v6 = vld [vmem:[%s460_s1 + $0x10] sm:$0xff]  ;;  %v173_v8 = vld [vmem:[%s460_s1 + $0x8] sm:$0xff]  ;;  %s168_s22 = scalar_lea.vmem %s462_s3, %s342_s19 }
   0xe   : > { %220 = vmatpush.msra.mxu1 %v175_v3  ;;  %249 = vmatpush.msra.mxu2 %v351_v1  ;;  %v349_v9 = vld [vmem:[%s460_s1 + $0x40] sm:$0xff]  ;;  %s164_s16 = scalar_lea.vmem %s459_s0, %s357_s7 }
   0xf   : > { %198 = vmatpush.msra.mxu0 %v345_v4  ;;  %v343_v10 = vld [vmem:[%s460_s1 + $0x20] sm:$0xff]  ;;  %v171_v12 = vld [vmem:[%s164_s16 + $0x10] sm:$0xff]  ;;  %v170_v13 = vld [vmem:[%s164_s16 + $0x8] sm:$0xff] }
  0x10   : > { %221 = vmatpush.msra.mxu1 %v174_v6  ;;  %250 = vmatpush.msra.mxu2 %v350_v5  ;;  %v172_v11 = vld [vmem:[%s460_s1] sm:$0xff] }
  0x11   : > { %199 = vmatpush.msra.mxu0 %v344_v7  ;;  %v169_v14 = vld [vmem:[%s164_s16] sm:$0xff] }
  0x12   : > { %222 = vmatpush.msra.mxu1 %v173_v8  ;;  %251 = vmatpush.msra.mxu2 %v349_v9  ;;  %v366_v18 = vld [vmem:[%s461_s2] ss:$0 sm:$0xff] }
  0x13   : > { %200 = vmatpush.msra.mxu0 %v343_v10  ;;  %353 = vmatmul.msk.f32.vlgmr.msra.gmra.mxu2 %vm181_vm0, %v171_v12 }
  0x14   : > { %223 = vmatpush.msra.mxu1 %v172_v11  ;;  %347 = vmatmul.msk.f32.vlgmr.msra.gmra.mxu0 %vm181_vm0, %v170_v13 }
  0x15   : > { %348 = vmatmul.msk.f32.vlgmr.msra.gmra.mxu1 %vm181_vm0, %v169_v14 }
  0x91   : > { %v202_v15 = vpop.f32.mrf.mxu0 }
  0x92   : > { %v225_v16 = vpop.f32.mrf.mxu1 }
  0x93   : > { %v226_v17 = vadd.f32 %v225_v16, %v202_v15 }
  0x96   : > { %v253_v19 = vpop.f32.mrf.mxu2 }
  0x97   : > { %v256_v20 = vadd.f32 %v253_v19, %v226_v17 }
  0x99   : > { %v261_v21 = vadd.f32 %v366_v18, %v256_v20 }
  0x9b   : > { %v354_v22 = vmul.f32 -1.442695, %v261_v21 }
  0x9d   : > { %367 = vpow2.f32 %v354_v22 }
  0xa3   : > { %v368_v23 = vpop.eup %367 }
  0xa4   : > { %v265_v24 = vadd.f32 1.0, %v368_v23 }
  0xa6   : > { %369 = vrcp.f32 %v265_v24  ;;  %v277_v28 = vand.u32 2147483648, %v265_v24  ;;  %v275_v30 = vand.u32 2147483647, %v265_v24  ;;  %vm271_vm2 = vweird.f32 %v265_v24 }
  0xa8   : > { %v278_v32 = vor.u32 1.1754944e-38, %v277_v28  ;;  %vm276_vm5 = vcmp.eq.f32.partialorder %v275_v30, 8.507059e+37 }
  0xac   : > { %v370_v25 = vpop.eup %369 }
  0xad   : > { %v267_v26 = vmul.f32 %v370_v25, %v265_v24  ;;  %vm272_vm1 = vweird.f32 %v370_v25 }
  0xae   : > { %vm273_vm3 = vmor %vm271_vm2, %vm272_vm1 }
  0xaf   : > { %v268_v27 = vsub.f32 1.0, %v267_v26 }
  0xb1   : > { %v269_v29 = vmul.f32 %v370_v25, %v268_v27 }
  0xb3   : > { %v270_v31 = vadd.f32 %v370_v25, %v269_v29 }
  0xb5   : > { %v274_v33 = vsel %vm273_vm3, %v370_v25, %v270_v31 }
  0xb6   : > { %v279_v34 = vsel %vm276_vm5, %v278_v32, %v274_v33 }
  0xb7   : > { %282 = vst.msk [vmem:[%s168_s22] sm:$0xff] %vm281_vm4, %v279_v34 }
  0xb8 PF: > { %s13_s12 = sadd.s32 1, %s377_s12  }
  0xb9   : > { %p10_p4 = scmp.ge.s32.totalorder %s13_s12, 4  }
  0xbb   :  { %12 = sbr.rel (!%p10_p4) target bundleno = 1 (0x1), region = 64 }

</bundles_post_ra>
